<compile_context>
chip_gen: v6e
topology: v6e:2x2x1
jax: 0.10.0
libtpu: 0.0.40
codegen_flags: <defaults>
</compile_context>

<pallas_src>
import jax
import jax.numpy as jnp
from jax.experimental import pallas as pl
from jax.experimental.pallas import tpu as pltpu


def linear_k2_kernel(x_ref, p_ref, o_ref):
    """Row-wise Linear with K=2 on the VPU (no MXU, no transpose).

    x_ref: (M, 2)  activations
    p_ref: (3, N)  packed params: rows 0..1 = W^T (K, N), row 2 = bias
    o_ref: (M, N)  output
    """
    x = x_ref[...]
    p = p_ref[...]
    # y[m, n] = x[m, 0]*W^T[0, n] + x[m, 1]*W^T[1, n] + b[n]
    y = x[:, 0:1] * p[0:1, :] + x[:, 1:2] * p[1:2, :] + p[2:3, :]
    o_ref[...] = y.astype(o_ref.dtype)


def pallas_linear_k2(x2d: jax.Array, packed: jax.Array) -> jax.Array:
    """x2d: (M, 2) f32, packed: (K+1, N) f32 -> (M, N) f32."""
    M = x2d.shape[0]
    N = packed.shape[1]
    vmem = pltpu.MemorySpace.VMEM
    return pl.pallas_call(
        linear_k2_kernel,
        out_shape=jax.ShapeDtypeStruct((M, N), x2d.dtype),
        in_specs=[
            pl.BlockSpec(memory_space=vmem),   # full-extent block, no grid
            pl.BlockSpec(memory_space=vmem),
        ],
        out_specs=pl.BlockSpec(memory_space=vmem),
    )(x2d, packed)


@jax.jit
def _forward(x: jax.Array, packed: jax.Array) -> jax.Array:
    flat = x.reshape(12)          # x.view(12)            (metadata-only)
    rows = flat.reshape(-1, 2)    # (6, 2) rows for Linear(2, 3)
    return pallas_linear_k2(rows, packed)  # (6, 3)


class Model:
    """JAX/Pallas equivalent of the PyTorch Model above."""

    def __init__(self, key: jax.Array):
        in_f, out_f = 2, 3
        kw, kb = jax.random.split(key)
        # Deterministic init mirroring nn.Linear's U(-1/sqrt(in), 1/sqrt(in)).
        bound = 1.0 / jnp.sqrt(jnp.float32(in_f))
        self.weight = jax.random.uniform(
            kw, (out_f, in_f), jnp.float32, -bound, bound)   # (3, 2), torch layout
        self.bias = jax.random.uniform(
            kb, (out_f,), jnp.float32, -bound, bound)        # (3,)
        # Host-side layout plumbing, done once: pack W^T (2,3) and bias (1,3)
        # into one (3,3) operand so the kernel gets only two inputs and never
        # transposes or reshapes anything.
        self.packed = jnp.concatenate(
            [jnp.transpose(self.weight), self.bias.reshape(1, out_f)], axis=0)

    def __call__(self, x: jax.Array) -> jax.Array:
        return _forward(x, self.packed)


if __name__ == "__main__":
    key = jax.random.PRNGKey(0)
    k_param, k_x = jax.random.split(key)

    model = Model(k_param)

    # Input with exactly 12 elements so that x.view(12) is valid.
    x = jax.random.normal(k_x, (2, 3, 2), dtype=jnp.float32)

    out = model(x)
    out = jax.block_until_ready(out)

    # Reference check in plain JAX (same chosen semantics).
    ref = x.reshape(-1, 2) @ model.weight.T + model.bias
    assert out.shape == (6, 3)
    assert jnp.allclose(out, ref, atol=1e-5, rtol=1e-5)

    print("KERNEL_OK")
</pallas_src>

<mosaic_0001>
module attributes {stable_mosaic.version = 11 : i64} {
  func.func @linear_k2_kernel(%arg0: memref<6x2xf32, #tpu.memory_space<vmem>>, %arg1: memref<3x3xf32, #tpu.memory_space<vmem>>, %arg2: memref<6x3xf32, #tpu.memory_space<vmem>>) attributes {dimension_semantics = [], scalar_prefetch = 0 : i64, scratch_operands = 0 : i64, tpu.core_type = #tpu.core_type<tc>} {
    %c0 = arith.constant 0 : index
    %c0_0 = arith.constant 0 : index
    %0 = vector.load %arg0[%c0, %c0_0] : memref<6x2xf32, #tpu.memory_space<vmem>>, vector<6x2xf32>
    %c0_1 = arith.constant 0 : index
    %c0_2 = arith.constant 0 : index
    %1 = vector.load %arg1[%c0_1, %c0_2] : memref<3x3xf32, #tpu.memory_space<vmem>>, vector<3x3xf32>
    %2 = vector.extract_strided_slice %0 {offsets = [0, 0], sizes = [6, 1], strides = [1, 1]} : vector<6x2xf32> to vector<6x1xf32>
    %3 = vector.extract_strided_slice %1 {offsets = [0, 0], sizes = [1, 3], strides = [1, 1]} : vector<3x3xf32> to vector<1x3xf32>
    %4 = vector.broadcast %2 : vector<6x1xf32> to vector<6x3xf32>
    %5 = vector.broadcast %3 : vector<1x3xf32> to vector<6x3xf32>
    %6 = arith.mulf %4, %5 : vector<6x3xf32>
    %7 = vector.extract_strided_slice %0 {offsets = [0, 1], sizes = [6, 1], strides = [1, 1]} : vector<6x2xf32> to vector<6x1xf32>
    %8 = vector.extract_strided_slice %1 {offsets = [1, 0], sizes = [1, 3], strides = [1, 1]} : vector<3x3xf32> to vector<1x3xf32>
    %9 = vector.broadcast %7 : vector<6x1xf32> to vector<6x3xf32>
    %10 = vector.broadcast %8 : vector<1x3xf32> to vector<6x3xf32>
    %11 = arith.mulf %9, %10 : vector<6x3xf32>
    %12 = arith.addf %6, %11 : vector<6x3xf32>
    %13 = vector.extract_strided_slice %1 {offsets = [2, 0], sizes = [1, 3], strides = [1, 1]} : vector<3x3xf32> to vector<1x3xf32>
    %14 = vector.broadcast %13 : vector<1x3xf32> to vector<6x3xf32>
    %15 = arith.addf %12, %14 : vector<6x3xf32>
    %c0_3 = arith.constant 0 : index
    %c0_4 = arith.constant 0 : index
    %16 = vector.load %arg2[%c0_3, %c0_4] : memref<6x3xf32, #tpu.memory_space<vmem>>, vector<6x3xf32>
    tpu.vector_store %arg2[%c0_3, %c0_4], %15 {strides = array<i32>} : memref<6x3xf32, #tpu.memory_space<vmem>>, vector<6x3xf32>,
    return
  }
}

</mosaic_0001>

<bundles_post_ra>
// kernel: _forward.1
= control target key start
LH: loop header
LB: loop body
LE: loop exit
PB: predicated region body
PF: predicated region fallthrough
CT: control target
= control target key end

     0   :  { %v48_v0 = vmov 0   ;;  %v49_v2 = vmov 1   ;;  %v18_v3 = vlaneseq  ;;  %vm38_vm0 = vcmask 21504   ;;  %s74_s0 = inlined_call_operand.vmem [shape: f32[6,2], index: 0, kind: input, shape index: {}]   ;;  %s75_s1 = inlined_call_operand.vmem [shape: f32[3,3], index: 1, kind: input, shape index: {}]   ;;  %s76_s2 = inlined_call_operand.vmem [shape: f32[6,3], index: 2, kind: output, shape index: {}]  }
   0x1   :  { %46 = vset.pattern.permute.xlu0 %v48_v0  ;;  %v11_v1 = vld [vmem:[%s74_s0] sm:$0x3f] }
   0x2   :  { %15 = vperm.xlu0 %46, %v11_v1   ;;  %v19_v4 = vshrl.u32 %v18_v3, 7  ;;  %v12_v7 = vld [vmem:[%s75_s1] sm:$0x7] }
   0x4   :  { %v20_v5 = vsub.s32 0, %v19_v4  ;;  %v29_v6 = vsub.s32 1, %v19_v4  ;;  %v35_v11 = vsub.s32 2, %v19_v4 }
   0x6   :  { %47 = vset.pattern.permute.xlu0 %v49_v2  ;;  %v21_v9 = vrot.slane %v12_v7, %v20_v5  ;;  %v30_v10 = vrot.slane %v12_v7, %v29_v6  ;;  %v36_v14 = vrot.slane %v12_v7, %v35_v11 }
   0x7   :  { %24 = vperm.xlu0 %47, %v11_v1  }
  0x7d   :  { %v16_v8 = vpop.permute.xlu0 %15 }
  0x7e   :  { %v22_v13 = vmul.f32 %v21_v9, %v16_v8 }
  0x82   :  { %v25_v12 = vpop.permute.xlu0 %24 }
  0x83   :  { %v31_v15 = vmul.f32 %v30_v10, %v25_v12 }
  0x85   :  { %v32_v16 = vadd.f32 %v31_v15, %v22_v13 }
  0x87   :  { %v37_v17 = vadd.f32 %v36_v14, %v32_v16 }
  0x89   :  { %39 = vst.msk [vmem:[%s76_s2] sm:$0x3f] %vm38_vm0, %v37_v17 }

</bundles_post_ra>
